<compile_context>
chip_gen: v7x
topology: tpu7x:2x2x1
jax: 0.10.0
libtpu: 0.0.40
codegen_flags: <defaults>
</compile_context>

<pallas_src>
import functools
import math

import jax
import jax.numpy as jnp
from jax.experimental import pallas as pl
from jax.experimental.pallas import tpu as pltpu


def _round_up(x, m):
    return ((x + m - 1) // m) * m


def _vmem_capacity_bytes():
    try:
        cap = int(pltpu.get_tpu_info().vmem_capacity_bytes)
        if cap > 0:
            return cap
    except Exception:
        pass
    return 64 * 1024 * 1024  # conservative fallback (v7x per-TensorCore)


def vap_kernel(x_ref, w1_ref, w2_ref, wp_ref, bp_ref, out_ref,
               feat_ref, wcol_ref, acc_ref, *, n_segment):
    # x_ref:   (TN, T, D)         input features for TN clips (input dtype)
    # w1_ref:  (128, 4*TT)        TES first linear, transposed, rows >= TT zero,
    #                             pre-scaled by 1/D (GAP fold)
    # w2_ref:  (4*TT, TT)         TES second linear, transposed, no bias
    # wp_ref:  (D, C_pad)         classifier weight, transposed, zero-padded classes
    # bp_ref:  (1, C_pad)         classifier bias (zero-padded), f32
    # out_ref: (TN, C_pad)
    # feat_ref:(TT, TN, D)        VMEM scratch, pooled pyramid features (input dtype)
    # wcol_ref:(TN, 128)          VMEM scratch, lane-dense GAP column sums (f32)
    # acc_ref: (TN, D)            VMEM scratch, f32 softmax-weighted accumulator
    T = n_segment
    level = int(round(math.log2(T)))
    TT = T - 1

    # Zero the GAP-column scratch so the padded lanes (>= TT) contribute nothing
    # through the zero rows of w1 (uninitialized VMEM could hold NaNs).  Done every
    # step (cheap) so it stays correct when the grid axis is core-sharded.
    wcol_ref[...] = jnp.zeros_like(wcol_ref)

    # --- Hierarchical pyramid dilated temporal max pooling --------------------
    # MaxPool3d(kernel=(T//t,1,1), stride=1, dilation=(t,1,1)) on (N, D, T, 1, 1):
    # timescale t, phase j  ==  max over x[:, j + m*t, :].
    # Flat concat order (matches torch.cat over dim 2): index = (t - 1) + j.
    # Hierarchy: feat(t, j) = max(feat(2t, j), feat(2t, j + t)); the finest level
    # (t = T/2) is a pairwise max straight from x.  Total maxes = T - 1.
    # GAP column sums go straight to the lane-dense scratch (f32 accumulation).
    t = T // 2
    for j in range(t):
        idx = t - 1 + j
        f = jnp.maximum(x_ref[:, j, :], x_ref[:, j + t, :])
        feat_ref[idx] = f
        wcol_ref[:, idx:idx + 1] = jnp.sum(
            f.astype(jnp.float32), axis=-1, keepdims=True)

    for i in reversed(range(level - 1)):
        t = 2 ** i
        for j in range(t):
            idx = t - 1 + j
            f = jnp.maximum(feat_ref[2 * t - 1 + j], feat_ref[2 * t - 1 + j + t])
            feat_ref[idx] = f
            wcol_ref[:, idx:idx + 1] = jnp.sum(
                f.astype(jnp.float32), axis=-1, keepdims=True)

    # --- TES: (GAP/D folded into w1) Linear -> ReLU -> Linear -> softmax -------
    w = wcol_ref[...]                                                      # (TN, 128)
    h = jnp.maximum(
        jnp.dot(w, w1_ref[...], preferred_element_type=jnp.float32), 0.0)  # (TN, 4TT)
    logits = jnp.dot(h, w2_ref[...], preferred_element_type=jnp.float32)   # (TN, TT)
    logits = logits - jnp.max(logits, axis=1, keepdims=True)
    e = jnp.exp(logits)
    sm = e / jnp.sum(e, axis=1, keepdims=True)                             # (TN, TT)

    # --- Weighted sum over timescales (f32 accumulation in VMEM scratch) -------
    acc_ref[...] = feat_ref[0].astype(jnp.float32) * sm[:, 0:1]
    for k in range(1, TT):
        acc_ref[...] += feat_ref[k].astype(jnp.float32) * sm[:, k:k + 1]

    # TODO(synk): nn.Dropout is identity in eval mode; training-mode masking not implemented.

    # --- Classifier: Linear(D -> C_pad) with (padded) bias ----------------------
    acc = acc_ref[...].astype(wp_ref.dtype)  # bf16 classifier weights: cast acc too
    out = jnp.dot(acc, wp_ref[...], preferred_element_type=jnp.float32) + bp_ref[...]
    out_ref[...] = out.astype(out_ref.dtype)


def prepare_vap_params(w1_t, w2_t, wp_t, bias, *, feature_dim, param_dtype=None):
    """One-time parameter preprocessing (hoisted out of the per-call path).

    w1_t: (TT, 4*TT)  TES first linear, transposed (input-dim first), no bias.
    w2_t: (4*TT, TT)  TES second linear, transposed, no bias.
    wp_t: (D, C)      classifier weight, transposed.
    bias: (C,)        classifier bias.
    param_dtype: optional dtype for the classifier weight (e.g. jnp.bfloat16).
    """
    tt = w1_t.shape[0]
    assert tt <= 128, "n_segment too large for the 128-lane GAP scratch"
    d, num_class = wp_t.shape
    assert d == feature_dim
    c_pad = _round_up(num_class, 128)

    # Fold the GAP 1/D scaling into w1 and zero-pad its contraction dim to a full
    # 128-lane tile (matches the lane-dense GAP-column scratch in the kernel).
    w1_pad = jnp.zeros((128, w1_t.shape[1]), jnp.float32)
    w1_pad = w1_pad.at[:tt, :].set(w1_t.astype(jnp.float32) * (1.0 / feature_dim))
    w2 = w2_t.astype(jnp.float32)

    wp_dtype = wp_t.dtype if param_dtype is None else param_dtype
    wp_pad = jnp.zeros((d, c_pad), wp_dtype).at[:, :num_class].set(
        wp_t.astype(wp_dtype))
    b_pad = jnp.zeros((1, c_pad), jnp.float32).at[0, :num_class].set(
        bias.astype(jnp.float32))
    return dict(w1=w1_pad, w2=w2, wp=wp_pad, b=b_pad, num_class=num_class, tt=tt)


def vap_forward(x, params, n_segment, *, tn=None):
    """x: (N*n_segment, D); params from prepare_vap_params; returns (N, num_class)."""
    nt, d = x.shape
    assert nt % n_segment == 0, "batch must be a multiple of n_segment"
    assert n_segment >= 2 and (n_segment & (n_segment - 1)) == 0, \
        "n_segment must be a power of two"
    n = nt // n_segment
    tt = n_segment - 1

    w1, w2, wp, bp = params["w1"], params["w2"], params["wp"], params["b"]
    num_class = params["num_class"]
    assert params["tt"] == tt
    assert w1.shape == (128, 4 * tt) and w2.shape == (4 * tt, tt)
    c_pad = wp.shape[1]
    assert wp.shape[0] == d and bp.shape == (1, c_pad)

    x3 = x.reshape(n, n_segment, d)
    itemsize = jnp.dtype(x.dtype).itemsize
    wp_itemsize = jnp.dtype(wp.dtype).itemsize

    # --- VMEM budget / limit derived from the actual per-core capacity ----------
    cap = _vmem_capacity_bytes()
    budget = min(int(cap * 0.6), 64 << 20)          # ~38 MiB on v7x, 64 MiB on v5e/v6e
    vmem_limit = min(int(cap * 0.75), 96 << 20)     # ~48 MiB on v7x, 96 MiB on v5e/v6e

    def vmem_estimate(tn_):
        x_tile = 2 * tn_ * n_segment * d * itemsize          # double-buffered input
        out_tile = 2 * tn_ * c_pad * 4                       # double-buffered output
        feat = tt * tn_ * d * itemsize                       # pyramid scratch (x dtype)
        acc = tn_ * d * 4                                    # f32 accumulator scratch
        wcol = tn_ * 128 * 4                                 # GAP column scratch
        weights = ((128 * 4 * tt + 4 * tt * tt) * 4          # single-buffered weights
                   + d * c_pad * wp_itemsize + c_pad * 4)
        work = 2 * tn_ * d * 4                               # streaming temporaries
        return x_tile + out_tile + feat + acc + wcol + weights + work

    # --- choose clip tile TN: byte target for the x tile (scales with D and T) --
    n8 = _round_up(n, 8)
    auto_tn = tn is None
    if auto_tn:
        bytes_per_clip = n_segment * d * itemsize
        target_x_bytes = max(4 << 20, min(16 << 20, budget // 4))
        tn = _round_up(max(1, target_x_bytes // bytes_per_clip), 8)
    tn = max(8, _round_up(tn, 8))
    tn = min(tn, n8)
    if auto_tn and tn >= n8 and n8 >= 16:
        # prefer >= 2 grid steps so both v7x TensorCores get work
        tn = _round_up((n8 + 1) // 2, 8)
    while tn > 8 and vmem_estimate(tn) > budget:
        tn = max(8, _round_up(tn // 2, 8))

    n_pad = _round_up(n, tn)
    if n_pad != n:
        x3 = jnp.pad(x3, ((0, n_pad - n), (0, 0), (0, 0)))

    kernel = functools.partial(vap_kernel, n_segment=n_segment)
    const2 = lambda i: (0, 0)
    resident = pl.Buffered(1)   # weights never change across grid steps

    out = pl.pallas_call(
        kernel,
        out_shape=jax.ShapeDtypeStruct((n_pad, c_pad), jnp.float32),
        grid=(n_pad // tn,),
        in_specs=[
            pl.BlockSpec((tn, n_segment, d), lambda i: (i, 0, 0)),        # x tile
            pl.BlockSpec((128, 4 * tt), const2, pipeline_mode=resident),   # w1 (padded)
            pl.BlockSpec((4 * tt, tt), const2, pipeline_mode=resident),    # w2
            pl.BlockSpec((d, c_pad), const2, pipeline_mode=resident),      # wp (padded)
            pl.BlockSpec((1, c_pad), const2, pipeline_mode=resident),      # bias
        ],
        out_specs=pl.BlockSpec((tn, c_pad), lambda i: (i, 0)),
        scratch_shapes=[
            pltpu.VMEM((tt, tn, d), x.dtype),       # staged pyramid features
            pltpu.VMEM((tn, 128), jnp.float32),     # lane-dense GAP column sums
            pltpu.VMEM((tn, d), jnp.float32),       # f32 weighted-sum accumulator
        ],
        compiler_params=pltpu.CompilerParams(
            dimension_semantics=("parallel",),
            vmem_limit_bytes=int(vmem_limit),
        ),
    )(x3, w1, w2, wp, bp)

    return out[:n, :num_class]


def vap_reference(x, w1_t, w2_t, wp_t, bias, n_segment):
    """Pure-JAX reference mirroring the PyTorch forward."""
    nt, d = x.shape
    n = nt // n_segment
    xs = x.reshape(n, n_segment, d)
    level = int(round(math.log2(n_segment)))
    feats = []
    for i in range(level):
        t = 2 ** i
        for j in range(t):
            feats.append(jnp.max(xs[:, j::t, :], axis=1))
    xp = jnp.stack(feats, axis=1)                     # (N, TT, D)
    w = jnp.mean(xp, axis=2)                          # (N, TT)
    h = jnp.maximum(w @ w1_t, 0.0)
    logits = h @ w2_t
    sm = jax.nn.softmax(logits, axis=1)
    pooled = jnp.sum(xp * sm[:, :, None], axis=1)     # (N, D)
    return pooled @ wp_t + bias[None, :]


if __name__ == "__main__":
    # Small shapes consistent with the module.
    n_segment = 8          # VAP_level = 3, total_timescale = 7
    feature_dim = 32
    num_class = 16
    n_clips = 2
    total_ts = n_segment - 1

    key = jax.random.PRNGKey(0)
    kx, k1, k2, kp = jax.random.split(key, 4)

    x = jax.random.normal(kx, (n_clips * n_segment, feature_dim), dtype=jnp.float32)

    # Parameter init matching nn.init.normal_(weight, 0, 0.001), bias = 0.
    w1_t = 0.001 * jax.random.normal(k1, (total_ts, 4 * total_ts), dtype=jnp.float32)
    w2_t = 0.001 * jax.random.normal(k2, (4 * total_ts, total_ts), dtype=jnp.float32)
    wp_t = 0.001 * jax.random.normal(kp, (feature_dim, num_class), dtype=jnp.float32)
    bias = jnp.zeros((num_class,), dtype=jnp.float32)

    # --- f32 path: exact check against the reference ---------------------------
    params_f32 = prepare_vap_params(w1_t, w2_t, wp_t, bias, feature_dim=feature_dim)
    out = jax.block_until_ready(vap_forward(x, params_f32, n_segment))
    ref = vap_reference(x, w1_t, w2_t, wp_t, bias, n_segment)
    assert out.shape == (n_clips, num_class)
    assert jnp.allclose(out, ref, rtol=1e-4, atol=1e-5), "f32 mismatch vs reference"

    # --- bf16 activations + bf16 classifier weight (looser tolerance) ----------
    params_bf16 = prepare_vap_params(w1_t, w2_t, wp_t, bias, feature_dim=feature_dim,
                                     param_dtype=jnp.bfloat16)
    x_bf16 = x.astype(jnp.bfloat16)
    out_bf = jax.block_until_ready(vap_forward(x_bf16, params_bf16, n_segment))
    wp_bf_as_f32 = params_bf16["wp"][:, :num_class].astype(jnp.float32)
    ref_bf = vap_reference(x_bf16.astype(jnp.float32), w1_t, w2_t,
                           wp_bf_as_f32, bias, n_segment)
    assert out_bf.shape == (n_clips, num_class)
    assert jnp.allclose(out_bf, ref_bf, rtol=5e-2, atol=1e-3), "bf16 mismatch vs reference"

    print("KERNEL_OK")
</pallas_src>

<mosaic_0001>
module attributes {stable_mosaic.version = 11 : i64} {
  func.func @vap_kernel(%arg0: i32, %arg1: memref<8x8x32xf32, #tpu.memory_space<vmem>>, %arg2: memref<128x28xf32, #tpu.memory_space<vmem>>, %arg3: memref<28x7xf32, #tpu.memory_space<vmem>>, %arg4: memref<32x128xf32, #tpu.memory_space<vmem>>, %arg5: memref<1x128xf32, #tpu.memory_space<vmem>>, %arg6: memref<8x128xf32, #tpu.memory_space<vmem>>, %arg7: memref<7x8x32xf32, #tpu.memory_space<vmem>>, %arg8: memref<8x128xf32, #tpu.memory_space<vmem>>, %arg9: memref<8x32xf32, #tpu.memory_space<vmem>>) attributes {dimension_semantics = [#tpu.dimension_semantics<parallel>], iteration_bounds = array<i64: 1>, scalar_prefetch = 0 : i64, scratch_operands = 3 : i64, tpu.core_type = #tpu.core_type<tc>, window_params = [{transform_indices = @transform_0, window_bounds = array<i64: 8, 8, 32>}, {pipeline_mode = #tpu.pipeline_mode<synchronous>, transform_indices = @transform_1, window_bounds = array<i64: 128, 28>}, {pipeline_mode = #tpu.pipeline_mode<synchronous>, transform_indices = @transform_2, window_bounds = array<i64: 28, 7>}, {pipeline_mode = #tpu.pipeline_mode<synchronous>, transform_indices = @transform_3, window_bounds = array<i64: 32, 128>}, {pipeline_mode = #tpu.pipeline_mode<synchronous>, transform_indices = @transform_4, window_bounds = array<i64: 1, 128>}, {transform_indices = @transform_5, window_bounds = array<i64: 8, 128>}]} {
    %cst = arith.constant 0.000000e+00 : f32
    %0 = vector.broadcast %cst : f32 to vector<8x128xf32>
    %c0 = arith.constant 0 : index
    %c0_0 = arith.constant 0 : index
    %1 = vector.load %arg8[%c0, %c0_0] : memref<8x128xf32, #tpu.memory_space<vmem>>, vector<8x128xf32>
    tpu.vector_store %arg8[%c0, %c0_0], %0 {strides = array<i32>} : memref<8x128xf32, #tpu.memory_space<vmem>>, vector<8x128xf32>,
    %c0_1 = arith.constant 0 : index
    %c0_2 = arith.constant 0 : index
    %c0_3 = arith.constant 0 : index
    %2 = vector.load %arg1[%c0_1, %c0_2, %c0_3] : memref<8x8x32xf32, #tpu.memory_space<vmem>>, vector<8x1x32xf32>
    %3 = vector.shape_cast %2 : vector<8x1x32xf32> to vector<8x32xf32>
    %c0_4 = arith.constant 0 : index
    %c4 = arith.constant 4 : index
    %c0_5 = arith.constant 0 : index
    %4 = vector.load %arg1[%c0_4, %c4, %c0_5] : memref<8x8x32xf32, #tpu.memory_space<vmem>>, vector<8x1x32xf32>
    %5 = vector.shape_cast %4 : vector<8x1x32xf32> to vector<8x32xf32>
    %6 = arith.maximumf %3, %5 : vector<8x32xf32>
    %c3 = arith.constant 3 : index
    %c0_6 = arith.constant 0 : index
    %c0_7 = arith.constant 0 : index
    %7 = vector.load %arg7[%c3, %c0_6, %c0_7] : memref<7x8x32xf32, #tpu.memory_space<vmem>>, vector<1x8x32xf32>
    %8 = vector.shape_cast %7 : vector<1x8x32xf32> to vector<8x32xf32>
    %9 = vector.shape_cast %6 : vector<8x32xf32> to vector<1x8x32xf32>
    tpu.vector_store %arg7[%c3, %c0_6, %c0_7], %9 {strides = array<i32>} : memref<7x8x32xf32, #tpu.memory_space<vmem>>, vector<1x8x32xf32>,
    %cst_8 = arith.constant dense<0.000000e+00> : vector<8xf32>
    %10 = vector.multi_reduction <add>, %6, %cst_8 [1] : vector<8x32xf32> to vector<8xf32>
    %11 = vector.shape_cast %10 : vector<8xf32> to vector<8x1xf32>
    %c0_9 = arith.constant 0 : index
    %c3_10 = arith.constant 3 : index
    %12 = vector.load %arg8[%c0_9, %c3_10] : memref<8x128xf32, #tpu.memory_space<vmem>>, vector<8x1xf32>
    tpu.vector_store %arg8[%c0_9, %c3_10], %11 {strides = array<i32>} : memref<8x128xf32, #tpu.memory_space<vmem>>, vector<8x1xf32>,
    %c0_11 = arith.constant 0 : index
    %c1 = arith.constant 1 : index
    %c0_12 = arith.constant 0 : index
    %13 = vector.load %arg1[%c0_11, %c1, %c0_12] : memref<8x8x32xf32, #tpu.memory_space<vmem>>, vector<8x1x32xf32>
    %14 = vector.shape_cast %13 : vector<8x1x32xf32> to vector<8x32xf32>
    %c0_13 = arith.constant 0 : index
    %c5 = arith.constant 5 : index
    %c0_14 = arith.constant 0 : index
    %15 = vector.load %arg1[%c0_13, %c5, %c0_14] : memref<8x8x32xf32, #tpu.memory_space<vmem>>, vector<8x1x32xf32>
    %16 = vector.shape_cast %15 : vector<8x1x32xf32> to vector<8x32xf32>
    %17 = arith.maximumf %14, %16 : vector<8x32xf32>
    %c4_15 = arith.constant 4 : index
    %c0_16 = arith.constant 0 : index
    %c0_17 = arith.constant 0 : index
    %18 = vector.load %arg7[%c4_15, %c0_16, %c0_17] : memref<7x8x32xf32, #tpu.memory_space<vmem>>, vector<1x8x32xf32>
    %19 = vector.shape_cast %18 : vector<1x8x32xf32> to vector<8x32xf32>
    %20 = vector.shape_cast %17 : vector<8x32xf32> to vector<1x8x32xf32>
    tpu.vector_store %arg7[%c4_15, %c0_16, %c0_17], %20 {strides = array<i32>} : memref<7x8x32xf32, #tpu.memory_space<vmem>>, vector<1x8x32xf32>,
    %cst_18 = arith.constant dense<0.000000e+00> : vector<8xf32>
    %21 = vector.multi_reduction <add>, %17, %cst_18 [1] : vector<8x32xf32> to vector<8xf32>
    %22 = vector.shape_cast %21 : vector<8xf32> to vector<8x1xf32>
    %c0_19 = arith.constant 0 : index
    %c4_20 = arith.constant 4 : index
    %23 = vector.load %arg8[%c0_19, %c4_20] : memref<8x128xf32, #tpu.memory_space<vmem>>, vector<8x1xf32>
    tpu.vector_store %arg8[%c0_19, %c4_20], %22 {strides = array<i32>} : memref<8x128xf32, #tpu.memory_space<vmem>>, vector<8x1xf32>,
    %c0_21 = arith.constant 0 : index
    %c2 = arith.constant 2 : index
    %c0_22 = arith.constant 0 : index
    %24 = vector.load %arg1[%c0_21, %c2, %c0_22] : memref<8x8x32xf32, #tpu.memory_space<vmem>>, vector<8x1x32xf32>
    %25 = vector.shape_cast %24 : vector<8x1x32xf32> to vector<8x32xf32>
    %c0_23 = arith.constant 0 : index
    %c6 = arith.constant 6 : index
    %c0_24 = arith.constant 0 : index
    %26 = vector.load %arg1[%c0_23, %c6, %c0_24] : memref<8x8x32xf32, #tpu.memory_space<vmem>>, vector<8x1x32xf32>
    %27 = vector.shape_cast %26 : vector<8x1x32xf32> to vector<8x32xf32>
    %28 = arith.maximumf %25, %27 : vector<8x32xf32>
    %c5_25 = arith.constant 5 : index
    %c0_26 = arith.constant 0 : index
    %c0_27 = arith.constant 0 : index
    %29 = vector.load %arg7[%c5_25, %c0_26, %c0_27] : memref<7x8x32xf32, #tpu.memory_space<vmem>>, vector<1x8x32xf32>
    %30 = vector.shape_cast %29 : vector<1x8x32xf32> to vector<8x32xf32>
    %31 = vector.shape_cast %28 : vector<8x32xf32> to vector<1x8x32xf32>
    tpu.vector_store %arg7[%c5_25, %c0_26, %c0_27], %31 {strides = array<i32>} : memref<7x8x32xf32, #tpu.memory_space<vmem>>, vector<1x8x32xf32>,
    %cst_28 = arith.constant dense<0.000000e+00> : vector<8xf32>
    %32 = vector.multi_reduction <add>, %28, %cst_28 [1] : vector<8x32xf32> to vector<8xf32>
    %33 = vector.shape_cast %32 : vector<8xf32> to vector<8x1xf32>
    %c0_29 = arith.constant 0 : index
    %c5_30 = arith.constant 5 : index
    %34 = vector.load %arg8[%c0_29, %c5_30] : memref<8x128xf32, #tpu.memory_space<vmem>>, vector<8x1xf32>
    tpu.vector_store %arg8[%c0_29, %c5_30], %33 {strides = array<i32>} : memref<8x128xf32, #tpu.memory_space<vmem>>, vector<8x1xf32>,
    %c0_31 = arith.constant 0 : index
    %c3_32 = arith.constant 3 : index
    %c0_33 = arith.constant 0 : index
    %35 = vector.load %arg1[%c0_31, %c3_32, %c0_33] : memref<8x8x32xf32, #tpu.memory_space<vmem>>, vector<8x1x32xf32>
    %36 = vector.shape_cast %35 : vector<8x1x32xf32> to vector<8x32xf32>
    %c0_34 = arith.constant 0 : index
    %c7 = arith.constant 7 : index
    %c0_35 = arith.constant 0 : index
    %37 = vector.load %arg1[%c0_34, %c7, %c0_35] : memref<8x8x32xf32, #tpu.memory_space<vmem>>, vector<8x1x32xf32>
    %38 = vector.shape_cast %37 : vector<8x1x32xf32> to vector<8x32xf32>
    %39 = arith.maximumf %36, %38 : vector<8x32xf32>
    %c6_36 = arith.constant 6 : index
    %c0_37 = arith.constant 0 : index
    %c0_38 = arith.constant 0 : index
    %40 = vector.load %arg7[%c6_36, %c0_37, %c0_38] : memref<7x8x32xf32, #tpu.memory_space<vmem>>, vector<1x8x32xf32>
    %41 = vector.shape_cast %40 : vector<1x8x32xf32> to vector<8x32xf32>
    %42 = vector.shape_cast %39 : vector<8x32xf32> to vector<1x8x32xf32>
    tpu.vector_store %arg7[%c6_36, %c0_37, %c0_38], %42 {strides = array<i32>} : memref<7x8x32xf32, #tpu.memory_space<vmem>>, vector<1x8x32xf32>,
    %cst_39 = arith.constant dense<0.000000e+00> : vector<8xf32>
    %43 = vector.multi_reduction <add>, %39, %cst_39 [1] : vector<8x32xf32> to vector<8xf32>
    %44 = vector.shape_cast %43 : vector<8xf32> to vector<8x1xf32>
    %c0_40 = arith.constant 0 : index
    %c6_41 = arith.constant 6 : index
    %45 = vector.load %arg8[%c0_40, %c6_41] : memref<8x128xf32, #tpu.memory_space<vmem>>, vector<8x1xf32>
    tpu.vector_store %arg8[%c0_40, %c6_41], %44 {strides = array<i32>} : memref<8x128xf32, #tpu.memory_space<vmem>>, vector<8x1xf32>,
    %c3_42 = arith.constant 3 : index
    %c0_43 = arith.constant 0 : index
    %c0_44 = arith.constant 0 : index
    %46 = vector.load %arg7[%c3_42, %c0_43, %c0_44] : memref<7x8x32xf32, #tpu.memory_space<vmem>>, vector<1x8x32xf32>
    %47 = vector.shape_cast %46 : vector<1x8x32xf32> to vector<8x32xf32>
    %c5_45 = arith.constant 5 : index
    %c0_46 = arith.constant 0 : index
    %c0_47 = arith.constant 0 : index
    %48 = vector.load %arg7[%c5_45, %c0_46, %c0_47] : memref<7x8x32xf32, #tpu.memory_space<vmem>>, vector<1x8x32xf32>
    %49 = vector.shape_cast %48 : vector<1x8x32xf32> to vector<8x32xf32>
    %50 = arith.maximumf %47, %49 : vector<8x32xf32>
    %c1_48 = arith.constant 1 : index
    %c0_49 = arith.constant 0 : index
    %c0_50 = arith.constant 0 : index
    %51 = vector.load %arg7[%c1_48, %c0_49, %c0_50] : memref<7x8x32xf32, #tpu.memory_space<vmem>>, vector<1x8x32xf32>
    %52 = vector.shape_cast %51 : vector<1x8x32xf32> to vector<8x32xf32>
    %53 = vector.shape_cast %50 : vector<8x32xf32> to vector<1x8x32xf32>
    tpu.vector_store %arg7[%c1_48, %c0_49, %c0_50], %53 {strides = array<i32>} : memref<7x8x32xf32, #tpu.memory_space<vmem>>, vector<1x8x32xf32>,
    %cst_51 = arith.constant dense<0.000000e+00> : vector<8xf32>
    %54 = vector.multi_reduction <add>, %50, %cst_51 [1] : vector<8x32xf32> to vector<8xf32>
    %55 = vector.shape_cast %54 : vector<8xf32> to vector<8x1xf32>
    %c0_52 = arith.constant 0 : index
    %c1_53 = arith.constant 1 : index
    %56 = vector.load %arg8[%c0_52, %c1_53] : memref<8x128xf32, #tpu.memory_space<vmem>>, vector<8x1xf32>
    tpu.vector_store %arg8[%c0_52, %c1_53], %55 {strides = array<i32>} : memref<8x128xf32, #tpu.memory_space<vmem>>, vector<8x1xf32>,
    %c4_54 = arith.constant 4 : index
    %c0_55 = arith.constant 0 : index
    %c0_56 = arith.constant 0 : index
    %57 = vector.load %arg7[%c4_54, %c0_55, %c0_56] : memref<7x8x32xf32, #tpu.memory_space<vmem>>, vector<1x8x32xf32>
    %58 = vector.shape_cast %57 : vector<1x8x32xf32> to vector<8x32xf32>
    %c6_57 = arith.constant 6 : index
    %c0_58 = arith.constant 0 : index
    %c0_59 = arith.constant 0 : index
    %59 = vector.load %arg7[%c6_57, %c0_58, %c0_59] : memref<7x8x32xf32, #tpu.memory_space<vmem>>, vector<1x8x32xf32>
    %60 = vector.shape_cast %59 : vector<1x8x32xf32> to vector<8x32xf32>
    %61 = arith.maximumf %58, %60 : vector<8x32xf32>
    %c2_60 = arith.constant 2 : index
    %c0_61 = arith.constant 0 : index
    %c0_62 = arith.constant 0 : index
    %62 = vector.load %arg7[%c2_60, %c0_61, %c0_62] : memref<7x8x32xf32, #tpu.memory_space<vmem>>, vector<1x8x32xf32>
    %63 = vector.shape_cast %62 : vector<1x8x32xf32> to vector<8x32xf32>
    %64 = vector.shape_cast %61 : vector<8x32xf32> to vector<1x8x32xf32>
    tpu.vector_store %arg7[%c2_60, %c0_61, %c0_62], %64 {strides = array<i32>} : memref<7x8x32xf32, #tpu.memory_space<vmem>>, vector<1x8x32xf32>,
    %cst_63 = arith.constant dense<0.000000e+00> : vector<8xf32>
    %65 = vector.multi_reduction <add>, %61, %cst_63 [1] : vector<8x32xf32> to vector<8xf32>
    %66 = vector.shape_cast %65 : vector<8xf32> to vector<8x1xf32>
    %c0_64 = arith.constant 0 : index
    %c2_65 = arith.constant 2 : index
    %67 = vector.load %arg8[%c0_64, %c2_65] : memref<8x128xf32, #tpu.memory_space<vmem>>, vector<8x1xf32>
    tpu.vector_store %arg8[%c0_64, %c2_65], %66 {strides = array<i32>} : memref<8x128xf32, #tpu.memory_space<vmem>>, vector<8x1xf32>,
    %c1_66 = arith.constant 1 : index
    %c0_67 = arith.constant 0 : index
    %c0_68 = arith.constant 0 : index
    %68 = vector.load %arg7[%c1_66, %c0_67, %c0_68] : memref<7x8x32xf32, #tpu.memory_space<vmem>>, vector<1x8x32xf32>
    %69 = vector.shape_cast %68 : vector<1x8x32xf32> to vector<8x32xf32>
    %c2_69 = arith.constant 2 : index
    %c0_70 = arith.constant 0 : index
    %c0_71 = arith.constant 0 : index
    %70 = vector.load %arg7[%c2_69, %c0_70, %c0_71] : memref<7x8x32xf32, #tpu.memory_space<vmem>>, vector<1x8x32xf32>
    %71 = vector.shape_cast %70 : vector<1x8x32xf32> to vector<8x32xf32>
    %72 = arith.maximumf %69, %71 : vector<8x32xf32>
    %c0_72 = arith.constant 0 : index
    %c0_73 = arith.constant 0 : index
    %c0_74 = arith.constant 0 : index
    %73 = vector.load %arg7[%c0_72, %c0_73, %c0_74] : memref<7x8x32xf32, #tpu.memory_space<vmem>>, vector<1x8x32xf32>
    %74 = vector.shape_cast %73 : vector<1x8x32xf32> to vector<8x32xf32>
    %75 = vector.shape_cast %72 : vector<8x32xf32> to vector<1x8x32xf32>
    tpu.vector_store %arg7[%c0_72, %c0_73, %c0_74], %75 {strides = array<i32>} : memref<7x8x32xf32, #tpu.memory_space<vmem>>, vector<1x8x32xf32>,
    %cst_75 = arith.constant dense<0.000000e+00> : vector<8xf32>
    %76 = vector.multi_reduction <add>, %72, %cst_75 [1] : vector<8x32xf32> to vector<8xf32>
    %77 = vector.shape_cast %76 : vector<8xf32> to vector<8x1xf32>
    %c0_76 = arith.constant 0 : index
    %c0_77 = arith.constant 0 : index
    %78 = vector.load %arg8[%c0_76, %c0_77] : memref<8x128xf32, #tpu.memory_space<vmem>>, vector<8x1xf32>
    tpu.vector_store %arg8[%c0_76, %c0_77], %77 {strides = array<i32>} : memref<8x128xf32, #tpu.memory_space<vmem>>, vector<8x1xf32>,
    %c0_78 = arith.constant 0 : index
    %c0_79 = arith.constant 0 : index
    %79 = vector.load %arg8[%c0_78, %c0_79] : memref<8x128xf32, #tpu.memory_space<vmem>>, vector<8x128xf32>
    %c0_80 = arith.constant 0 : index
    %c0_81 = arith.constant 0 : index
    %80 = vector.load %arg2[%c0_80, %c0_81] : memref<128x28xf32, #tpu.memory_space<vmem>>, vector<128x28xf32>
    %cst_82 = arith.constant dense<0.000000e+00> : vector<8x28xf32>
    %81 = tpu.matmul %79, %80, %cst_82 {dimension_numbers = #tpu.dot_dimension_numbers<[1], [0], [0], [1], [0, 0, 1, 1], [], []>} : vector<8x128xf32>, vector<128x28xf32>, vector<8x28xf32> -> vector<8x28xf32>
    %cst_83 = arith.constant 0.000000e+00 : f32
    %82 = vector.broadcast %cst_83 : f32 to vector<8x28xf32>
    %83 = arith.maximumf %81, %82 : vector<8x28xf32>
    %c0_84 = arith.constant 0 : index
    %c0_85 = arith.constant 0 : index
    %84 = vector.load %arg3[%c0_84, %c0_85] : memref<28x7xf32, #tpu.memory_space<vmem>>, vector<28x7xf32>
    %cst_86 = arith.constant dense<0.000000e+00> : vector<8x7xf32>
    %85 = tpu.matmul %83, %84, %cst_86 {dimension_numbers = #tpu.dot_dimension_numbers<[1], [0], [0], [1], [0, 0, 1, 1], [], []>} : vector<8x28xf32>, vector<28x7xf32>, vector<8x7xf32> -> vector<8x7xf32>
    %cst_87 = arith.constant dense<0xFF800000> : vector<8xf32>
    %86 = vector.multi_reduction <maximumf>, %85, %cst_87 [1] : vector<8x7xf32> to vector<8xf32>
    %87 = vector.shape_cast %86 : vector<8xf32> to vector<8x1xf32>
    %88 = vector.broadcast %87 : vector<8x1xf32> to vector<8x7xf32>
    %89 = arith.subf %85, %88 : vector<8x7xf32>
    %90 = math.exp %89 : vector<8x7xf32>
    %cst_88 = arith.constant dense<0.000000e+00> : vector<8xf32>
    %91 = vector.multi_reduction <add>, %90, %cst_88 [1] : vector<8x7xf32> to vector<8xf32>
    %92 = vector.shape_cast %91 : vector<8xf32> to vector<8x1xf32>
    %93 = vector.broadcast %92 : vector<8x1xf32> to vector<8x7xf32>
    %94 = arith.divf %90, %93 : vector<8x7xf32>
    %c0_89 = arith.constant 0 : index
    %c0_90 = arith.constant 0 : index
    %c0_91 = arith.constant 0 : index
    %95 = vector.load %arg7[%c0_89, %c0_90, %c0_91] : memref<7x8x32xf32, #tpu.memory_space<vmem>>, vector<1x8x32xf32>
    %96 = vector.shape_cast %95 : vector<1x8x32xf32> to vector<8x32xf32>
    %97 = vector.extract_strided_slice %94 {offsets = [0, 0], sizes = [8, 1], strides = [1, 1]} : vector<8x7xf32> to vector<8x1xf32>
    %98 = vector.broadcast %97 : vector<8x1xf32> to vector<8x32xf32>
    %99 = arith.mulf %96, %98 : vector<8x32xf32>
    %c0_92 = arith.constant 0 : index
    %c0_93 = arith.constant 0 : index
    %100 = vector.load %arg9[%c0_92, %c0_93] : memref<8x32xf32, #tpu.memory_space<vmem>>, vector<8x32xf32>
    tpu.vector_store %arg9[%c0_92, %c0_93], %99 {strides = array<i32>} : memref<8x32xf32, #tpu.memory_space<vmem>>, vector<8x32xf32>,
    %c0_94 = arith.constant 0 : index
    %c0_95 = arith.constant 0 : index
    %101 = vector.load %arg9[%c0_94, %c0_95] : memref<8x32xf32, #tpu.memory_space<vmem>>, vector<8x32xf32>
    %c1_96 = arith.constant 1 : index
    %c0_97 = arith.constant 0 : index
    %c0_98 = arith.constant 0 : index
    %102 = vector.load %arg7[%c1_96, %c0_97, %c0_98] : memref<7x8x32xf32, #tpu.memory_space<vmem>>, vector<1x8x32xf32>
    %103 = vector.shape_cast %102 : vector<1x8x32xf32> to vector<8x32xf32>
    %104 = vector.extract_strided_slice %94 {offsets = [0, 1], sizes = [8, 1], strides = [1, 1]} : vector<8x7xf32> to vector<8x1xf32>
    %105 = vector.broadcast %104 : vector<8x1xf32> to vector<8x32xf32>
    %106 = arith.mulf %103, %105 : vector<8x32xf32>
    %107 = arith.addf %101, %106 : vector<8x32xf32>
    %c0_99 = arith.constant 0 : index
    %c0_100 = arith.constant 0 : index
    %108 = vector.load %arg9[%c0_99, %c0_100] : memref<8x32xf32, #tpu.memory_space<vmem>>, vector<8x32xf32>
    tpu.vector_store %arg9[%c0_99, %c0_100], %107 {strides = array<i32>} : memref<8x32xf32, #tpu.memory_space<vmem>>, vector<8x32xf32>,
    %c0_101 = arith.constant 0 : index
    %c0_102 = arith.constant 0 : index
    %109 = vector.load %arg9[%c0_101, %c0_102] : memref<8x32xf32, #tpu.memory_space<vmem>>, vector<8x32xf32>
    %c2_103 = arith.constant 2 : index
    %c0_104 = arith.constant 0 : index
    %c0_105 = arith.constant 0 : index
    %110 = vector.load %arg7[%c2_103, %c0_104, %c0_105] : memref<7x8x32xf32, #tpu.memory_space<vmem>>, vector<1x8x32xf32>
    %111 = vector.shape_cast %110 : vector<1x8x32xf32> to vector<8x32xf32>
    %112 = vector.extract_strided_slice %94 {offsets = [0, 2], sizes = [8, 1], strides = [1, 1]} : vector<8x7xf32> to vector<8x1xf32>
    %113 = vector.broadcast %112 : vector<8x1xf32> to vector<8x32xf32>
    %114 = arith.mulf %111, %113 : vector<8x32xf32>
    %115 = arith.addf %109, %114 : vector<8x32xf32>
    %c0_106 = arith.constant 0 : index
    %c0_107 = arith.constant 0 : index
    %116 = vector.load %arg9[%c0_106, %c0_107] : memref<8x32xf32, #tpu.memory_space<vmem>>, vector<8x32xf32>
    tpu.vector_store %arg9[%c0_106, %c0_107], %115 {strides = array<i32>} : memref<8x32xf32, #tpu.memory_space<vmem>>, vector<8x32xf32>,
    %c0_108 = arith.constant 0 : index
    %c0_109 = arith.constant 0 : index
    %117 = vector.load %arg9[%c0_108, %c0_109] : memref<8x32xf32, #tpu.memory_space<vmem>>, vector<8x32xf32>
    %c3_110 = arith.constant 3 : index
    %c0_111 = arith.constant 0 : index
    %c0_112 = arith.constant 0 : index
    %118 = vector.load %arg7[%c3_110, %c0_111, %c0_112] : memref<7x8x32xf32, #tpu.memory_space<vmem>>, vector<1x8x32xf32>
    %119 = vector.shape_cast %118 : vector<1x8x32xf32> to vector<8x32xf32>
    %120 = vector.extract_strided_slice %94 {offsets = [0, 3], sizes = [8, 1], strides = [1, 1]} : vector<8x7xf32> to vector<8x1xf32>
    %121 = vector.broadcast %120 : vector<8x1xf32> to vector<8x32xf32>
    %122 = arith.mulf %119, %121 : vector<8x32xf32>
    %123 = arith.addf %117, %122 : vector<8x32xf32>
    %c0_113 = arith.constant 0 : index
    %c0_114 = arith.constant 0 : index
    %124 = vector.load %arg9[%c0_113, %c0_114] : memref<8x32xf32, #tpu.memory_space<vmem>>, vector<8x32xf32>
    tpu.vector_store %arg9[%c0_113, %c0_114], %123 {strides = array<i32>} : memref<8x32xf32, #tpu.memory_space<vmem>>, vector<8x32xf32>,
    %c0_115 = arith.constant 0 : index
    %c0_116 = arith.constant 0 : index
    %125 = vector.load %arg9[%c0_115, %c0_116] : memref<8x32xf32, #tpu.memory_space<vmem>>, vector<8x32xf32>
    %c4_117 = arith.constant 4 : index
    %c0_118 = arith.constant 0 : index
    %c0_119 = arith.constant 0 : index
    %126 = vector.load %arg7[%c4_117, %c0_118, %c0_119] : memref<7x8x32xf32, #tpu.memory_space<vmem>>, vector<1x8x32xf32>
    %127 = vector.shape_cast %126 : vector<1x8x32xf32> to vector<8x32xf32>
    %128 = vector.extract_strided_slice %94 {offsets = [0, 4], sizes = [8, 1], strides = [1, 1]} : vector<8x7xf32> to vector<8x1xf32>
    %129 = vector.broadcast %128 : vector<8x1xf32> to vector<8x32xf32>
    %130 = arith.mulf %127, %129 : vector<8x32xf32>
    %131 = arith.addf %125, %130 : vector<8x32xf32>
    %c0_120 = arith.constant 0 : index
    %c0_121 = arith.constant 0 : index
    %132 = vector.load %arg9[%c0_120, %c0_121] : memref<8x32xf32, #tpu.memory_space<vmem>>, vector<8x32xf32>
    tpu.vector_store %arg9[%c0_120, %c0_121], %131 {strides = array<i32>} : memref<8x32xf32, #tpu.memory_space<vmem>>, vector<8x32xf32>,
    %c0_122 = arith.constant 0 : index
    %c0_123 = arith.constant 0 : index
    %133 = vector.load %arg9[%c0_122, %c0_123] : memref<8x32xf32, #tpu.memory_space<vmem>>, vector<8x32xf32>
    %c5_124 = arith.constant 5 : index
    %c0_125 = arith.constant 0 : index
    %c0_126 = arith.constant 0 : index
    %134 = vector.load %arg7[%c5_124, %c0_125, %c0_126] : memref<7x8x32xf32, #tpu.memory_space<vmem>>, vector<1x8x32xf32>
    %135 = vector.shape_cast %134 : vector<1x8x32xf32> to vector<8x32xf32>
    %136 = vector.extract_strided_slice %94 {offsets = [0, 5], sizes = [8, 1], strides = [1, 1]} : vector<8x7xf32> to vector<8x1xf32>
    %137 = vector.broadcast %136 : vector<8x1xf32> to vector<8x32xf32>
    %138 = arith.mulf %135, %137 : vector<8x32xf32>
    %139 = arith.addf %133, %138 : vector<8x32xf32>
    %c0_127 = arith.constant 0 : index
    %c0_128 = arith.constant 0 : index
    %140 = vector.load %arg9[%c0_127, %c0_128] : memref<8x32xf32, #tpu.memory_space<vmem>>, vector<8x32xf32>
    tpu.vector_store %arg9[%c0_127, %c0_128], %139 {strides = array<i32>} : memref<8x32xf32, #tpu.memory_space<vmem>>, vector<8x32xf32>,
    %c0_129 = arith.constant 0 : index
    %c0_130 = arith.constant 0 : index
    %141 = vector.load %arg9[%c0_129, %c0_130] : memref<8x32xf32, #tpu.memory_space<vmem>>, vector<8x32xf32>
    %c6_131 = arith.constant 6 : index
    %c0_132 = arith.constant 0 : index
    %c0_133 = arith.constant 0 : index
    %142 = vector.load %arg7[%c6_131, %c0_132, %c0_133] : memref<7x8x32xf32, #tpu.memory_space<vmem>>, vector<1x8x32xf32>
    %143 = vector.shape_cast %142 : vector<1x8x32xf32> to vector<8x32xf32>
    %144 = vector.extract_strided_slice %94 {offsets = [0, 6], sizes = [8, 1], strides = [1, 1]} : vector<8x7xf32> to vector<8x1xf32>
    %145 = vector.broadcast %144 : vector<8x1xf32> to vector<8x32xf32>
    %146 = arith.mulf %143, %145 : vector<8x32xf32>
    %147 = arith.addf %141, %146 : vector<8x32xf32>
    %c0_134 = arith.constant 0 : index
    %c0_135 = arith.constant 0 : index
    %148 = vector.load %arg9[%c0_134, %c0_135] : memref<8x32xf32, #tpu.memory_space<vmem>>, vector<8x32xf32>
    tpu.vector_store %arg9[%c0_134, %c0_135], %147 {strides = array<i32>} : memref<8x32xf32, #tpu.memory_space<vmem>>, vector<8x32xf32>,
    %c0_136 = arith.constant 0 : index
    %c0_137 = arith.constant 0 : index
    %149 = vector.load %arg9[%c0_136, %c0_137] : memref<8x32xf32, #tpu.memory_space<vmem>>, vector<8x32xf32>
    %c0_138 = arith.constant 0 : index
    %c0_139 = arith.constant 0 : index
    %150 = vector.load %arg4[%c0_138, %c0_139] : memref<32x128xf32, #tpu.memory_space<vmem>>, vector<32x128xf32>
    %cst_140 = arith.constant dense<0.000000e+00> : vector<8x128xf32>
    %151 = tpu.matmul %149, %150, %cst_140 {dimension_numbers = #tpu.dot_dimension_numbers<[1], [0], [0], [1], [0, 0, 1, 1], [], []>} : vector<8x32xf32>, vector<32x128xf32>, vector<8x128xf32> -> vector<8x128xf32>
    %c0_141 = arith.constant 0 : index
    %c0_142 = arith.constant 0 : index
    %152 = vector.load %arg5[%c0_141, %c0_142] : memref<1x128xf32, #tpu.memory_space<vmem>>, vector<1x128xf32>
    %153 = vector.broadcast %152 : vector<1x128xf32> to vector<8x128xf32>
    %154 = arith.addf %151, %153 : vector<8x128xf32>
    %c0_143 = arith.constant 0 : index
    %c0_144 = arith.constant 0 : index
    %155 = vector.load %arg6[%c0_143, %c0_144] : memref<8x128xf32, #tpu.memory_space<vmem>>, vector<8x128xf32>
    tpu.vector_store %arg6[%c0_143, %c0_144], %154 {strides = array<i32>} : memref<8x128xf32, #tpu.memory_space<vmem>>, vector<8x128xf32>,
    return
  }
  func.func @transform_0(%arg0: i32) -> (i32, i32, i32) {
    %c0_i32 = arith.constant 0 : i32
    %c0_i32_0 = arith.constant 0 : i32
    %c0_i32_1 = arith.constant 0 : i32
    return %arg0, %c0_i32, %c0_i32_0 : i32, i32, i32
  }
  func.func @transform_1(%arg0: i32) -> (i32, i32) {
    %c0_i32 = arith.constant 0 : i32
    %c0_i32_0 = arith.constant 0 : i32
    %c0_i32_1 = arith.constant 0 : i32
    return %c0_i32, %c0_i32_0 : i32, i32
  }
  func.func @transform_2(%arg0: i32) -> (i32, i32) {
    %c0_i32 = arith.constant 0 : i32
    %c0_i32_0 = arith.constant 0 : i32
    %c0_i32_1 = arith.constant 0 : i32
    return %c0_i32, %c0_i32_0 : i32, i32
  }
  func.func @transform_3(%arg0: i32) -> (i32, i32) {
    %c0_i32 = arith.constant 0 : i32
    %c0_i32_0 = arith.constant 0 : i32
    %c0_i32_1 = arith.constant 0 : i32
    return %c0_i32, %c0_i32_0 : i32, i32
  }
  func.func @transform_4(%arg0: i32) -> (i32, i32) {
    %c0_i32 = arith.constant 0 : i32
    %c0_i32_0 = arith.constant 0 : i32
    %c0_i32_1 = arith.constant 0 : i32
    return %c0_i32, %c0_i32_0 : i32, i32
  }
  func.func @transform_5(%arg0: i32) -> (i32, i32) {
    %c0_i32 = arith.constant 0 : i32
    %c0_i32_0 = arith.constant 0 : i32
    return %arg0, %c0_i32 : i32, i32
  }
}

</mosaic_0001>

<bundles_post_ra>
// kernel: tpu_custom_call.1
= control target key start
LH: loop header
LB: loop body
LE: loop exit
PB: predicated region body
PF: predicated region fallthrough
CT: control target
= control target key end

     0   :  { %vm55_vm0 = vcmask 1041409   ;;  %vm58_vm1 = vcmask 1042434   ;;  %vm61_vm2 = vcmask 1043459   ;;  %vm64_vm3 = vcmask 1044484   ;;  %s1209_s0 = inlined_call_operand.vmem [shape: f32[8,8,32], index: 0, kind: input, shape index: {}]   ;;  %s1210_s1 = inlined_call_operand.vmem [shape: f32[128,28], index: 1, kind: input, shape index: {}]   ;;  %s1211_s2 = inlined_call_operand.vmem [shape: f32[28,7], index: 2, kind: input, shape index: {}]   ;;  %s1212_s3 = inlined_call_operand.vmem [shape: f32[32,128], index: 3, kind: input, shape index: {}]   ;;  %s1213_s4 = inlined_call_operand.vmem [shape: f32[1,128], index: 4, kind: input, shape index: {}]   ;;  %s1214_s5 = inlined_call_operand.hbm [shape: f32[8,128], index: 5, kind: output, shape index: {}]  }
   0x1   :  { %v22_v0 = vld [vmem:[%s1209_s0] sm:$0x1]  ;;  %v23_v1 = vld [vmem:[%s1209_s0 + $0x8] sm:$0x1]  ;;  %v24_v2 = vld [vmem:[%s1209_s0 + $0x10] sm:$0x1] }
   0x2   :  { %v25_v3 = vld [vmem:[%s1209_s0 + $0x18] sm:$0x1]  ;;  %v26_v4 = vld [vmem:[%s1209_s0 + $0x20] sm:$0x1]  ;;  %v27_v5 = vld [vmem:[%s1209_s0 + $0x28] sm:$0x1] }
   0x3   :  { %v28_v6 = vld [vmem:[%s1209_s0 + $0x30] sm:$0x1]  ;;  %v29_v7 = vld [vmem:[%s1209_s0 + $0x38] sm:$0x1]  ;;  %v30_v8 = vld [vmem:[%s1209_s0 + $0x4] sm:$0x1] }
   0x4   :  { %v31_v9 = vld [vmem:[%s1209_s0 + $0xc] sm:$0x1]  ;;  %v32_v10 = vld [vmem:[%s1209_s0 + $0x14] sm:$0x1]  ;;  %v33_v11 = vld [vmem:[%s1209_s0 + $0x1c] sm:$0x1]  ;;  %v38_v15 = vmax.f32 %v22_v0, %v30_v8 }
   0x5   :  { %v34_v12 = vld [vmem:[%s1209_s0 + $0x24] sm:$0x1]  ;;  %v35_v13 = vld [vmem:[%s1209_s0 + $0x2c] sm:$0x1]  ;;  %v36_v14 = vld [vmem:[%s1209_s0 + $0x34] sm:$0x1]  ;;  %v39_v16 = vmax.f32 %v23_v1, %v31_v9  ;;  %v40_v17 = vmax.f32 %v24_v2, %v32_v10  ;;  %v41_v18 = vmax.f32 %v25_v3, %v33_v11 }
   0x6   :  { %v37_v19 = vld [vmem:[%s1209_s0 + $0x3c] sm:$0x1]  ;;  %v42_v20 = vmax.f32 %v26_v4, %v34_v12  ;;  %v43_v21 = vmax.f32 %v27_v5, %v35_v13  ;;  %v44_v22 = vmax.f32 %v28_v6, %v36_v14  ;;  %v885_v28 = vld [vmem:[%s1209_s0 + $0x1] sm:$0x1]  ;;  %v85_v29 = vld [vmem:[%s1209_s0 + $0x9] sm:$0x1] }
   0x7   :  { %v45_v23 = vmax.f32 %v29_v7, %v37_v19  ;;  %v54_v24 = vrot.slane %v39_v16, 7  ;;  %v57_v25 = vrot.slane %v40_v17, 6  ;;  %v60_v26 = vrot.slane %v41_v18, 5  ;;  %v276_v30 = vld [vmem:[%s1210_s1] sm:$0xff]  ;;  %v277_v31 = vld [vmem:[%s1210_s1 + $0x8] sm:$0xff]  ;;  %v278_v37 = vld [vmem:[%s1210_s1 + $0x10] sm:$0xff] }
   0x8   :  { %v63_v27 = vrot.slane %v42_v20, 4  ;;  %v66_v33 = vrot.slane %v43_v21, 3  ;;  %vm67_vm4 = vcmask 1045509   ;;  %v69_v34 = vrot.slane %v44_v22, 2  ;;  %v86_v35 = vld [vmem:[%s1209_s0 + $0x11] sm:$0x1] }
   0x9   :  { %v56_v32 = vsel %vm55_vm0, %v54_v24, %v38_v15  ;;  %v87_v36 = vld [vmem:[%s1209_s0 + $0x19] sm:$0x1]  ;;  %vm70_vm5 = vcmask 1046534   ;;  %v72_v39 = vrot.slane %v45_v23, 1  ;;  %vm73_vm6 = vcmask 1047559  }
   0xa   :  { %v59_v38 = vsel %vm58_vm1, %v57_v25, %v56_v32  ;;  %v88_v40 = vld [vmem:[%s1209_s0 + $0x21] sm:$0x1]  ;;  %v279_v41 = vld [vmem:[%s1210_s1 + $0x18] sm:$0xff]  ;;  %vm77_vm7 = vcmask 261120   ;;  %v89_v43 = vld [vmem:[%s1209_s0 + $0x29] sm:$0x1]  ;;  %v708_v45 = vpack.c.bf16 %v277_v31, %v276_v30 }
   0xb   :  { %v62_v42 = vsel %vm61_vm2, %v60_v26, %v59_v38  ;;  %v90_v44 = vld [vmem:[%s1209_s0 + $0x31] sm:$0x1]  ;;  %v91_v47 = vld [vmem:[%s1209_s0 + $0x39] sm:$0x1]  ;;  %v92_v48 = vld [vmem:[%s1209_s0 + $0x5] sm:$0x1]  ;;  %v711_v57 = vpack.c.bf16 %v279_v41, %v278_v37 }
   0xc   :  { %v65_v46 = vsel %vm64_vm3, %v63_v27, %v62_v42  ;;  %v93_v49 = vld [vmem:[%s1209_s0 + $0xd] sm:$0x1]  ;;  %v792_v50 = vmov 0.0|0.0   ;;  %v94_v52 = vld [vmem:[%s1209_s0 + $0x15] sm:$0x1]  ;;  %v100_v55 = vmax.f32 %v885_v28, %v92_v48 }
   0xd   :  { %707 = vmatprep.subr.bf16.mxu0 %v792_v50  ;;  %731 = vmatprep.subr.bf16.mxu1 %v792_v50  ;;  %v68_v51 = vsel %vm67_vm4, %v66_v33, %v65_v46  ;;  %v95_v53 = vld [vmem:[%s1209_s0 + $0x1d] sm:$0x1]  ;;  %v96_v54 = vld [vmem:[%s1209_s0 + $0x25] sm:$0x1]  ;;  %v101_v56 = vmax.f32 %v85_v29, %v93_v49  ;;  %v97_v59 = vld [vmem:[%s1209_s0 + $0x2d] sm:$0x1]  ;;  %v102_v62 = vmax.f32 %v86_v35, %v94_v52 }
   0xe   :  { %709 = vmatpush3.bf16.msra.mxu0 %v708_v45  ;;  %v71_v58 = vsel %vm70_vm5, %v69_v34, %v68_v51  ;;  %v98_v60 = vld [vmem:[%s1209_s0 + $0x35] sm:$0x1]  ;;  %v99_v61 = vld [vmem:[%s1209_s0 + $0x3d] sm:$0x1]  ;;  %v103_v63 = vmax.f32 %v87_v36, %v95_v53  ;;  %v104_v0 = vmax.f32 %v88_v40, %v96_v54  ;;  %v105_v2 = vmax.f32 %v89_v43, %v97_v59  ;;  %v138_v5 = vld [vmem:[%s1209_s0 + $0x2] sm:$0x1] }
   0xf   :  { %710 = vmatprep.subr.bf16.mxu0 %v792_v50  ;;  %v74_v1 = vsel %vm73_vm6, %v72_v39, %v71_v58  ;;  %v106_v3 = vmax.f32 %v90_v44, %v98_v60  ;;  %v107_v4 = vmax.f32 %v91_v47, %v99_v61  ;;  %v139_v6 = vld [vmem:[%s1209_s0 + $0xa] sm:$0x1]  ;;  %v140_v7 = vld [vmem:[%s1209_s0 + $0x12] sm:$0x1]  ;;  %v116_v9 = vrot.slane %v101_v56, 7 }
  0x10   :  { %v79_v8 = vsel %vm77_vm7, %v74_v1, 0.0  ;;  %78 = vst.msk [vmem:[#allocation2 + $0x18] sm:$0xff] %vm77_vm7, %v74_v1  ;;  %v118_v10 = vrot.slane %v102_v62, 6  ;;  %v120_v11 = vrot.slane %v103_v63, 5  ;;  %v141_v12 = vld [vmem:[%s1209_s0 + $0x1a] sm:$0x1] }
  0x11   :  { %80 = vadd.xlane.f32.xlu0 %v79_v8  ;;  %v122_v13 = vrot.slane %v104_v0, 4  ;;  %v124_v14 = vrot.slane %v105_v2, 3  ;;  %v126_v15 = vrot.slane %v106_v3, 2  ;;  %v128_v16 = vrot.slane %v107_v4, 1  ;;  %v142_v17 = vld [vmem:[%s1209_s0 + $0x22] sm:$0x1] }
  0x12   :  { %712 = vmatpush3.bf16.msra.mxu0 %v711_v57  ;;  %v117_v18 = vsel %vm55_vm0, %v116_v9, %v100_v55  ;;  %v143_v19 = vld [vmem:[%s1209_s0 + $0x2a] sm:$0x1]  ;;  %v144_v20 = vld [vmem:[%s1209_s0 + $0x32] sm:$0x1]  ;;  %v145_v21 = vld [vmem:[%s1209_s0 + $0x3a] sm:$0x1] }
  0x13   :  { %713 = vmatprep.subr.bf16.mxu0 %v792_v50  ;;  %v119_v22 = vsel %vm58_vm1, %v118_v10, %v117_v18  ;;  %v146_v23 = vld [vmem:[%s1209_s0 + $0x6] sm:$0x1]  ;;  %v147_v24 = vld [vmem:[%s1209_s0 + $0xe] sm:$0x1]  ;;  %v148_v25 = vld [vmem:[%s1209_s0 + $0x16] sm:$0x1] }
  0x14   :  { %v121_v26 = vsel %vm61_vm2, %v120_v11, %v119_v22  ;;  %v149_v27 = vld [vmem:[%s1209_s0 + $0x1e] sm:$0x1]  ;;  %v150_v28 = vld [vmem:[%s1209_s0 + $0x26] sm:$0x1]  ;;  %v151_v29 = vld [vmem:[%s1209_s0 + $0x2e] sm:$0x1]  ;;  %v154_v30 = vmax.f32 %v138_v5, %v146_v23  ;;  %v155_v31 = vmax.f32 %v139_v6, %v147_v24  ;;  %v156_v32 = vmax.f32 %v140_v7, %v148_v25 }
  0x15   :  { %v123_v33 = vsel %vm64_vm3, %v122_v13, %v121_v26  ;;  %v152_v34 = vld [vmem:[%s1209_s0 + $0x36] sm:$0x1]  ;;  %v153_v35 = vld [vmem:[%s1209_s0 + $0x3e] sm:$0x1]  ;;  %v157_v36 = vmax.f32 %v141_v12, %v149_v27  ;;  %v158_v37 = vmax.f32 %v142_v17, %v150_v28  ;;  %v159_v38 = vmax.f32 %v143_v19, %v151_v29  ;;  %v192_v43 = vld [vmem:[%s1209_s0 + $0x3] sm:$0x1] }
  0x16   :  { %v125_v39 = vsel %vm67_vm4, %v124_v14, %v123_v33  ;;  %v160_v40 = vmax.f32 %v144_v20, %v152_v34  ;;  %v161_v41 = vmax.f32 %v145_v21, %v153_v35  ;;  %v170_v42 = vrot.slane %v155_v31, 7  ;;  %v193_v44 = vld [vmem:[%s1209_s0 + $0xb] sm:$0x1]  ;;  %v194_v45 = vld [vmem:[%s1209_s0 + $0x13] sm:$0x1]  ;;  %v280_v20 = vld [vmem:[%s1210_s1 + $0x20] sm:$0xff] }
  0x17   :  { %v127_v46 = vsel %vm70_vm5, %v126_v15, %v125_v39  ;;  %v172_v47 = vrot.slane %v156_v32, 6  ;;  %v174_v48 = vrot.slane %v157_v36, 5  ;;  %v176_v49 = vrot.slane %v158_v37, 4  ;;  %v195_v51 = vld [vmem:[%s1209_s0 + $0x1b] sm:$0x1]  ;;  %v281_v21 = vld [vmem:[%s1210_s1 + $0x28] sm:$0xff] }
  0x18   :  { %v129_v52 = vsel %vm73_vm6, %v128_v16, %v127_v46  ;;  %v171_v53 = vsel %vm55_vm0, %v170_v42, %v154_v30  ;;  %v178_v54 = vrot.slane %v159_v38, 3  ;;  %v180_v55 = vrot.slane %v160_v40, 2  ;;  %v196_v56 = vld [vmem:[%s1209_s0 + $0x23] sm:$0x1]  ;;  %v197_v57 = vld [vmem:[%s1209_s0 + $0x2b] sm:$0x1] }
  0x19   :  { %132 = vst.msk [vmem:[#allocation2 + $0x20] sm:$0xff] %vm77_vm7, %v129_v52  ;;  %v133_v58 = vsel %vm77_vm7, %v129_v52, 0.0  ;;  %v173_v59 = vsel %vm58_vm1, %v172_v47, %v171_v53  ;;  %v182_v60 = vrot.slane %v161_v41, 1  ;;  %v198_v61 = vld [vmem:[%s1209_s0 + $0x33] sm:$0x1] }
  0x1a   :  { %v199_v62 = vld [vmem:[%s1209_s0 + $0x3b] sm:$0x1]  ;;  %134 = vadd.xlane.f32.xlu0 %v133_v58  ;;  %v175_v63 = vsel %vm61_vm2, %v174_v48, %v173_v59  ;;  %v200_v0 = vld [vmem:[%s1209_s0 + $0x7] sm:$0x1]  ;;  %v201_v1 = vld [vmem:[%s1209_s0 + $0xf] sm:$0x1] }
  0x1b   :  { %v202_v2 = vld [vmem:[%s1209_s0 + $0x17] sm:$0x1]  ;;  %v177_v3 = vsel %vm64_vm3, %v176_v49, %v175_v63  ;;  %v203_v4 = vld [vmem:[%s1209_s0 + $0x1f] sm:$0x1]  ;;  %v204_v5 = vld [vmem:[%s1209_s0 + $0x27] sm:$0x1]  ;;  %v208_v7 = vmax.f32 %v192_v43, %v200_v0  ;;  %v209_v8 = vmax.f32 %v193_v44, %v201_v1 }
  0x1c   :  { %v205_v6 = vld [vmem:[%s1209_s0 + $0x2f] sm:$0x1]  ;;  %v210_v9 = vmax.f32 %v194_v45, %v202_v2  ;;  %v179_v10 = vsel %vm67_vm4, %v178_v54, %v177_v3  ;;  %v206_v11 = vld [vmem:[%s1209_s0 + $0x37] sm:$0x1]  ;;  %v207_v12 = vld [vmem:[%s1209_s0 + $0x3f] sm:$0x1]  ;;  %v211_v13 = vmax.f32 %v195_v51, %v203_v4  ;;  %v212_v14 = vmax.f32 %v196_v56, %v204_v5 }
  0x1d   :  { %v213_v15 = vmax.f32 %v197_v57, %v205_v6  ;;  %v181_v16 = vsel %vm70_vm5, %v180_v55, %v179_v10  ;;  %v214_v17 = vmax.f32 %v198_v61, %v206_v11  ;;  %v215_v18 = vmax.f32 %v199_v62, %v207_v12 }
  0x1e   :  { %v224_v19 = vrot.slane %v209_v8, 7 }
  0x1f   :  { %10 = vsyncpa [#allocation6], 0  ;;  %v183_v22 = vsel %vm73_vm6, %v182_v60, %v181_v16  ;;  %v226_v23 = vrot.slane %v210_v9, 6  ;;  %v228_v24 = vrot.slane %v211_v13, 5  ;;  %v230_v25 = vrot.slane %v212_v14, 4  ;;  %v282_v29 = vld [vmem:[%s1210_s1 + $0x30] sm:$0xff] }
  0x20   :  { %v187_v26 = vsel %vm77_vm7, %v183_v22, 0.0  ;;  %186 = vst.msk [vmem:[#allocation2 + $0x28] sm:$0xff] %vm77_vm7, %v183_v22  ;;  %v225_v27 = vsel %vm55_vm0, %v224_v19, %v208_v7  ;;  %v232_v28 = vrot.slane %v213_v15, 3  ;;  %v283_v30 = vld [vmem:[%s1210_s1 + $0x38] sm:$0xff]  ;;  %v234_v32 = vrot.slane %v214_v17, 2  ;;  %v1104_v47 = vld [vmem:[#allocation2 + $0x20] sm:$0xff] }
  0x21   :  { %188 = vadd.xlane.f32.xlu1 %v187_v26  ;;  %v227_v31 = vsel %vm58_vm1, %v226_v23, %v225_v27  ;;  %v714_v33 = vpack.c.bf16 %v281_v21, %v280_v20  ;;  %v236_v35 = vrot.slane %v215_v18, 1  ;;  %v793_v37 = vmov 0.0   ;;  %v1092_v41 = vld [vmem:[#allocation2 + $0x18] sm:$0xff]  ;;  %v284_v51 = vld [vmem:[%s1210_s1 + $0x40] sm:$0xff]  ;;  %v285_v52 = vld [vmem:[%s1210_s1 + $0x48] sm:$0xff]  ;;  %s803_s16 = smov [#allocation5]  }
  0x22   :  { %v229_v34 = vsel %vm61_vm2, %v228_v24, %v227_v31  ;;  %21 = vst [vmem:[#allocation3] sm:$0xff] %v793_v37  ;;  %v717_v38 = vpack.c.bf16 %v283_v30, %v282_v29  ;;  %v720_v53 = vpack.c.bf16 %v285_v52, %v284_v51  ;;  %v286_v58 = vld [vmem:[%s1210_s1 + $0x50] sm:$0xff]  ;;  %v287_v59 = vld [vmem:[%s1210_s1 + $0x58] sm:$0xff]  ;;  %v288_v62 = vld [vmem:[%s1210_s1 + $0x60] sm:$0xff]  ;;  %vm794_vm8 = vmmov 0   ;;  %s611_s17 = sshll.u32 %s803_s16, 4  ;;  %s612_s17 = int_to_ptr.vmem [resolvable:$true] %s611_s17 }
  0x23   :  { %v231_v36 = vsel %vm64_vm3, %v230_v25, %v229_v34  ;;  %715 = vmatpush3.bf16.msra.mxu0 %v714_v33  ;;  %v723_v60 = vpack.c.bf16 %v287_v59, %v286_v58  ;;  %v289_v63 = vld [vmem:[%s1210_s1 + $0x68] sm:$0xff]  ;;  %v290_v1 = vld [vmem:[%s1210_s1 + $0x70] sm:$0xff]  ;;  %v291_v2 = vld [vmem:[%s1210_s1 + $0x78] sm:$0xff]  ;;  %682 = vmatprep.mubr.msk.f32.mxu0 %vm794_vm8, %v793_v37  ;;  %vm82_vm9 = vcmask 31768   ;;  %vm136_vm10 = vcmask 39968   ;;  %s768_s18 = scalar_lea.vmem %s612_s17, 128  ;;  %p773_p1 = scmp.lt.s32.totalorder %s612_s17, %s612_s17 }
  0x24   :  { %v233_v39 = vsel %vm67_vm4, %v232_v28, %v231_v36  ;;  %716 = vmatprep.subr.bf16.mxu0 %v792_v50  ;;  %v726_v0 = vpack.c.bf16 %v289_v63, %v288_v62  ;;  %v729_v3 = vpack.c.bf16 %v291_v2, %v290_v1  ;;  %693 = vmatprep.mubr.msk.f32.mxu1 %vm794_vm8, %v793_v37  ;;  %v363_v4 = vld [vmem:[%s1211_s2] sm:$0xff]  ;;  %v364_v5 = vld [vmem:[%s1211_s2 + $0x8] sm:$0xff]  ;;  %vm190_vm11 = vcmask 48168   ;;  %v365_v15 = vld [vmem:[%s1211_s2 + $0x10] sm:$0xff]  ;;  %p769_p0 = scmp.ne.s32.totalorder %s612_s17, %s768_s18  ;;  %p774_p2 = scmp.lt.s32.totalorder %s768_s18, %s768_s18 }
  0x25   :  { %v235_v40 = vsel %vm70_vm5, %v234_v32, %v233_v39  ;;  %v732_v6 = vpack.c.bf16 %v364_v5, %v363_v4  ;;  %vm244_vm12 = vcmask 56368   ;;  %vm254_vm13 = vcmask 15368   ;;  %v366_v16 = vld [vmem:[%s1211_s2 + $0x18] sm:$0xf]  ;;  %v520_v39 = vld [vmem:[%s1212_s3] sm:$0xff] }
  0x26   :  { %v237_v42 = vsel %vm73_vm6, %v236_v35, %v235_v40  ;;  %vm264_vm14 = vcmask 23568   ;;  %vm273_vm15 = vcmask 7168   ;;  %vm371_vm0 = vcmask 1043456   ;;  %v521_v40 = vld [vmem:[%s1212_s3 + $0x8] sm:$0xff]  ;;  %p775_p3 = por %p774_p2, %p773_p1 }
  0x27   :  { %240 = vst.msk [vmem:[#allocation2 + $0x30] sm:$0xff] %vm77_vm7, %v237_v42  ;;  %v241_v43 = vsel %vm77_vm7, %v237_v42, 0.0  ;;  %v1097_v44 = vld [vmem:[#allocation2 + $0x28] sm:$0xff]  ;;  %718 = vmatpush3.bf16.msra.mxu0 %v717_v38  ;;  %733 = vmatpush3.bf16.msra.mxu1 %v732_v6  ;;  %v735_v17 = vpack.c.bf16 %v366_v16, %v365_v15  ;;  %vm795_vm1 = vmmov 1   ;;  %vm367_vm3 = vcmask 228352  }
  0x28   :  { %242 = vadd.xlane.f32.xlu1 %v241_v43  ;;  %v248_v45 = vmax.f32 %v1092_v41, %v1097_v44  ;;  %719 = vmatprep.subr.bf16.mxu0 %v792_v50  ;;  %vm736_vm2 = vmpackc.low %vm371_vm0, %vm795_vm1  ;;  %vm445_vm4 = vcmask 56320   ;;  %v796_v29 = vmov 1   ;;  %v797_v30 = vmov 0   ;;  %v522_v43 = vld [vmem:[%s1212_s3 + $0x10] sm:$0xff]  ;;  %p776_p4 = pnand %p775_p3, %p769_p0 }
  0x29   :  { %734 = vmatprep.subr.bf16.mxu1 %v792_v50  ;;  %757 = vset.pattern.permute.xlu0 %v796_v29  ;;  %v798_v34 = vmov 2   ;;  %v799_v35 = vmov 6   ;;  %v800_v36 = vmov 3   ;;  %v802_v38 = vmov 5  }
  0x2a   :  { %v251_v46 = vsel %vm77_vm7, %v248_v45, 0.0  ;;  %250 = vst.msk [vmem:[#allocation2 + $0x8] sm:$0xff] %vm77_vm7, %v248_v45  ;;  %756 = vset.pattern.permute.xlu1 %v797_v30  ;;  %v739_v42 = vpack.c.bf16 %v521_v40, %v520_v39  ;;  %v523_v45 = vld [vmem:[%s1212_s3 + $0x18] sm:$0xff] }
  0x2b   :  { %252 = vadd.xlane.f32.xlu0 %v251_v46  ;;  %721 = vmatpush3.bf16.msra.mxu0 %v720_v53  ;;  %v742_v46 = vpack.c.bf16 %v523_v45, %v522_v43 }
  0x2c   :  { %722 = vmatprep.subr.bf16.mxu0 %v792_v50  ;;  %737 = vmatpush3.bf16.msk.msra.mxu1 %vm736_vm2, %v735_v17 }
  0x2d   :  { %738 = vmatprep.subr.bf16.mxu1 %v792_v50 }
  0x2e   :  { %v1106_v48 = vld [vmem:[#allocation2 + $0x30] sm:$0xff] }
  0x2f   :  { %v258_v49 = vmax.f32 %v1104_v47, %v1106_v48  ;;  %724 = vmatpush3.bf16.msra.mxu0 %v723_v60 }
  0x30   :  { %725 = vmatprep.subr.bf16.mxu0 %v792_v50 }
  0x31   :  { %v261_v54 = vsel %vm77_vm7, %v258_v49, 0.0  ;;  %260 = vst.msk [vmem:[#allocation2 + $0x10] sm:$0xff] %vm77_vm7, %v258_v49  ;;  %v1119_v55 = vld [vmem:[#allocation2 + $0x8] sm:$0xff] }
  0x32   :  { %262 = vadd.xlane.f32.xlu1 %v261_v54 }
  0x33   :  { %727 = vmatpush3.bf16.msra.mxu0 %v726_v0 }
  0x34   :  { %728 = vmatprep.subr.bf16.mxu0 %v792_v50 }
  0x37   :  { %730 = vmatpush3.bf16.msra.mxu0 %v729_v3 }
  0x38   :  { %v1121_v56 = vld [vmem:[#allocation2 + $0x10] sm:$0xff] }
  0x39   :  { %v268_v57 = vmax.f32 %v1119_v55, %v1121_v56 }
  0x3b   :  { %v270_v61 = vsel %vm77_vm7, %v268_v57, 0.0  ;;  %269 = vst.msk [vmem:[#allocation2] sm:$0xff] %vm77_vm7, %v268_v57 }
  0x3c   :  { %271 = vadd.xlane.f32.xlu0 %v270_v61 }
  0x42   :  { %v457_v49 = vld [vmem:[#allocation2] sm:$0xff] }
  0x9e   :  { %v81_v7 = vpop.xlane.xlu0 %80 }
  0x9f   :  { %83 = vst.msk [vmem:[#allocation3] sm:$0xff] %vm82_vm9, %v81_v7 }
  0xa7   :  { %v135_v8 = vpop.xlane.xlu0 %134 }
  0xa8   :  { %137 = vst.msk [vmem:[#allocation3] sm:$0xff] %vm136_vm10, %v135_v8 }
  0xae   :  { %v189_v9 = vpop.xlane.xlu1 %188 }
  0xaf   :  { %191 = vst.msk [vmem:[#allocation3] sm:$0xff] %vm190_vm11, %v189_v9 }
  0xb5   :  { %v243_v10 = vpop.xlane.xlu1 %242 }
  0xb6   :  { %245 = vst.msk [vmem:[#allocation3] sm:$0xff] %vm244_vm12, %v243_v10 }
  0xb8   :  { %v253_v11 = vpop.xlane.xlu0 %252 }
  0xb9   :  { %255 = vst.msk [vmem:[#allocation3] sm:$0xff] %vm254_vm13, %v253_v11 }
  0xbf   :  { %v263_v12 = vpop.xlane.xlu1 %262 }
  0xc0   :  { %265 = vst.msk [vmem:[#allocation3] sm:$0xff] %vm264_vm14, %v263_v12 }
  0xc9   :  { %v272_v13 = vpop.xlane.xlu0 %271 }
  0xca   :  { %274 = vst.msk [vmem:[#allocation3] sm:$0xff] %vm273_vm15, %v272_v13 }
  0xd1   :  { %v275_v14 = vld [vmem:[#allocation3] sm:$0xff] }
  0xd2   :  { %683 = vmatmul.mubr.f32.vlgmr.msra.gmra.mrb[0].mxu0 %v275_v14 }
 0x1a5   :  { %v358_v18 = vpop.f32.mrb[0].mxu0 }
 0x1a6   :  { %v362_v19 = vmax.f32 %v358_v18, 0.0  ;;  %v684_v20 = vpop.f32.mrb[1].mxu0 }
 0x1a8   :  { %694 = vmatmul.mubr.msk.f32.vlgmr.msra.gmra.mrb[0].mxu1 %vm367_vm3, %v362_v19 }
 0x1a9   :  { %704 = vmatprep.mubr.msk.f32.mxu1 %vm794_vm8, %v793_v37  ;;  %v801_v37 = vmov 4   ;;  %740 = vmatpush3.bf16.msra.mxu1 %v739_v42 }
 0x1aa   :  { %741 = vmatprep.subr.bf16.mxu1 %v792_v50 }
 0x1ad   :  { %743 = vmatpush3.bf16.msra.mxu1 %v742_v46 }
 0x27b   :  { %v441_v21 = vpop.f32.mrb[0].mxu1 }
 0x27c   :  { %v695_v22 = vpop.f32.mrb[1].mxu1  ;;  %v446_v23 = vsel %vm445_vm4, %v441_v21, -inf }
 0x27d   :  { %447 = vmax.xlane.f32.xlu1 %v446_v23 }
 0x30a   :  { %v448_v24 = vpop.xlane.xlu1 %447 }
 0x30b   :  { %v449_v25 = vsub.f32 %v441_v21, %v448_v24 }
 0x30d   :  { %v450_v26 = vmul.f32 1.442695, %v449_v25 }
 0x30f   :  { %764 = vpow2.f32 %v450_v26 }
 0x319   :  { %v765_v27 = vpop.eup %764 }
 0x31a   :  { %v452_v28 = vsel %vm445_vm4, %v765_v27, 0.0 }
 0x31b   :  { %453 = vadd.xlane.f32.xlu0 %v452_v28 }
 0x3a8   :  { %v454_v31 = vpop.xlane.xlu0 %453 }
 0x3a9   :  { %766 = vrcp.f32 %v454_v31 }
 0x3b3   :  { %v767_v32 = vpop.eup %766 }
 0x3b4   :  { %v456_v33 = vmul.f32 %v767_v32, %v765_v27 }
 0x3b6   :  { %468 = vperm.xlu0 %757, %v456_v33   ;;  %460 = vperm.xlu1 %756, %v456_v33  }
 0x3ba   :  { %758 = vset.pattern.permute.xlu1 %v798_v34  ;;  %763 = vset.pattern.permute.xlu0 %v799_v35 }
 0x3bb   :  { %477 = vperm.xlu1 %758, %v456_v33  }
 0x3bf   :  { %759 = vset.pattern.permute.xlu1 %v800_v36 }
 0x3c0   :  { %486 = vperm.xlu1 %759, %v456_v33  }
 0x3c4   :  { %760 = vset.pattern.permute.xlu1 %v801_v37 }
 0x3c5   :  { %495 = vperm.xlu1 %760, %v456_v33  }
 0x3c9   :  { %761 = vset.pattern.permute.xlu1 %v802_v38 }
 0x3ca   :  { %504 = vperm.xlu1 %761, %v456_v33  }
 0x3ce   :  { %762 = vset.pattern.permute.xlu1 %v799_v35 }
 0x3cf   :  { %513 = vperm.xlu1 %762, %v456_v33  }
 0x435   :  { %v461_v51 = vpop.permute.xlu1 %460  ;;  %v469_v53 = vpop.permute.xlu0 %468 }
 0x436   :  { %v463_v52 = vmul.f32 %v461_v51, %v457_v49  ;;  %v471_v54 = vmul.f32 %v469_v53, %v1119_v55 }
 0x438   :  { %464 = vst.msk [vmem:[#allocation4] sm:$0xff] %vm77_vm7, %v463_v52 }
 0x43a   :  { %v478_v59 = vpop.permute.xlu1 %477 }
 0x43b   :  { %v480_v60 = vmul.f32 %v478_v59, %v1121_v56 }
 0x43f   :  { %v465_v57 = vld [vmem:[#allocation4] sm:$0xff]  ;;  %v487_v50 = vpop.permute.xlu1 %486 }
 0x440   :  { %v472_v58 = vadd.f32 %v471_v54, %v465_v57  ;;  %v489_v63 = vmul.f32 %v487_v50, %v1092_v41 }
 0x442   :  { %473 = vst.msk [vmem:[#allocation4] sm:$0xff] %vm77_vm7, %v472_v58 }
 0x444   :  { %v496_v2 = vpop.permute.xlu1 %495 }
 0x445   :  { %v498_v55 = vmul.f32 %v496_v2, %v1104_v47  ;;  %v621_v47 = vld [vmem:[%s1213_s4] ss:$0 sm:$0xff] }
 0x449   :  { %v474_v61 = vld [vmem:[#allocation4] sm:$0xff]  ;;  %v505_v5 = vpop.permute.xlu1 %504 }
 0x44a   :  { %v481_v62 = vadd.f32 %v480_v60, %v474_v61  ;;  %v507_v56 = vmul.f32 %v505_v5, %v1097_v44 }
 0x44c   :  { %482 = vst.msk [vmem:[#allocation4] sm:$0xff] %vm77_vm7, %v481_v62 }
 0x44e   :  { %v514_v8 = vpop.permute.xlu1 %513 }
 0x44f   :  { %v516_v41 = vmul.f32 %v514_v8, %v1106_v48 }
 0x453   :  { %v483_v0 = vld [vmem:[#allocation4] sm:$0xff] }
 0x454   :  { %v490_v1 = vadd.f32 %v489_v63, %v483_v0 }
 0x456   :  { %491 = vst.msk [vmem:[#allocation4] sm:$0xff] %vm77_vm7, %v490_v1 }
 0x45d   :  { %v492_v3 = vld [vmem:[#allocation4] sm:$0xff] }
 0x45e   :  { %v499_v4 = vadd.f32 %v498_v55, %v492_v3 }
 0x460   :  { %500 = vst.msk [vmem:[#allocation4] sm:$0xff] %vm77_vm7, %v499_v4 }
 0x467   :  { %v501_v6 = vld [vmem:[#allocation4] sm:$0xff] }
 0x468   :  { %v508_v7 = vadd.f32 %v507_v56, %v501_v6 }
 0x46a   :  { %509 = vst.msk [vmem:[#allocation4] sm:$0xff] %vm77_vm7, %v508_v7 }
 0x471   :  { %v510_v9 = vld [vmem:[#allocation4] sm:$0xff] }
 0x472   :  { %v517_v10 = vadd.f32 %v516_v41, %v510_v9 }
 0x474   :  { %518 = vst.msk [vmem:[#allocation4] sm:$0xff] %vm77_vm7, %v517_v10 }
 0x47b   :  { %v519_v11 = vld [vmem:[#allocation4] sm:$0xff] }
 0x47c   :  { %705 = vmatmul.mubr.msk.f32.vlgmr.msra.gmra.mrb[2].mxu1 %vm77_vm7, %v519_v11 }
 0x54f   :  { %v600_v44 = vpop.f32.mrb[2].mxu1 }
 0x550   :  { %v601_v12 = vadd.f32 %v621_v47, %v600_v44  ;;  %v706_v13 = vpop.f32.mrb[3].mxu1 }
 0x552   :  { %604 = vst [vmem:[#allocation5] sm:$0xff] %v601_v12 }
 0x553   :  { %779 = shalt.err (!%p776_p4)
}
 0x554   :  { %s780_s21 = scalar_lea.hbm %s1214_s5, 128 }
 0x555   :  { %p781_p5 = scmp.ne.s32.totalorder %s1214_s5, %s780_s21  ;;  %p784_p6 = scmp.lt.u32.totalorder %s780_s21, %s1214_s5 }
 0x557   :  { %p786_p7 = pnand %p784_p6, %p781_p5 }
 0x559   :  { %789 = shalt.err (!%p786_p7)
}
 0x55a   :  { %614 = dma.vmem_to_hbm [thread:$0]  %s612_s17, 128, %s1214_s5, [#allocation6]  }
 0x55b   :  { %790 = dma.done.wait [#allocation6], 128  }
 0x55c   :  { %791 = vsyncadd [#allocation6], 4294967168 }
 0x55d   :  { %618 = vsyncpa [#allocation6], 1 }

</bundles_post_ra>
